<compile_context>
chip_gen: v7x
topology: tpu7x:2x2x1
jax: 0.10.0
libtpu: 0.0.40
codegen_flags: <defaults>
</compile_context>

<pallas_src>
import math

import jax
import jax.numpy as jnp
from jax.experimental import pallas as pl
from jax.experimental.pallas import tpu as pltpu


_EPS = 1e-12                          # F.normalize default eps (clamps the L2 norm)
_EPS_SQ = _EPS * _EPS                 # equivalent clamp on the squared norm
_MAX_BLOCK_BYTES = 4 * 1024 * 1024    # per-block VMEM budget for the x block
_VMEM_LIMIT = 48 * 1024 * 1024        # explicit scoped-VMEM limit (< v7x 64 MiB physical)

_CPARAMS_1D = pltpu.CompilerParams(dimension_semantics=("parallel",),
                                   vmem_limit_bytes=_VMEM_LIMIT)
_CPARAMS_2D = pltpu.CompilerParams(dimension_semantics=("parallel", "parallel"),
                                   vmem_limit_bytes=_VMEM_LIMIT)


def _pick_tile(n, bytes_per_unit, min_blocks=1):
    """Tile for an axis of extent n.

    Returns either the full extent (always a legal block dim) or a multiple of
    128 (legal for lane/sublane dims) sized to _MAX_BLOCK_BYTES, split into
    >= min_blocks roughly-balanced blocks (v7x has 2 TensorCores).  Meant to be
    paired with a pl.cdiv(...) grid; Pallas masks the partial last block.
    """
    budget = max(1, _MAX_BLOCK_BYTES // max(1, bytes_per_unit))
    t_max = max(128, (budget // 128) * 128)
    if n <= 128:
        return n                       # single full-extent block
    if n <= t_max and min_blocks <= 1:
        return n                       # whole extent fits in one block
    nb = max(min_blocks, pl.cdiv(n, t_max))
    nb = min(nb, pl.cdiv(n, 128))      # never go below 128-wide blocks
    return pl.cdiv(pl.cdiv(n, nb), 128) * 128


# ------------------------------- kernels ------------------------------------

def _rms_norm_cf_kernel(x_ref, g_ref, o_ref):
    # x_ref: (1, C, TS)   g_ref: (C, 1) = gamma * sqrt(C)   o_ref: (1, C, TS)
    x = x_ref[0].astype(jnp.float32)                      # (C, TS)
    ss = jnp.sum(x * x, axis=0, keepdims=True)            # (1, TS) sublane reduce
    inv = jax.lax.rsqrt(jnp.maximum(ss, _EPS_SQ))         # EUP rsqrt
    o_ref[0] = (x * inv * g_ref[...]).astype(o_ref.dtype)


def _rms_norm_cf_bias_kernel(x_ref, g_ref, b_ref, o_ref):
    x = x_ref[0].astype(jnp.float32)
    ss = jnp.sum(x * x, axis=0, keepdims=True)
    inv = jax.lax.rsqrt(jnp.maximum(ss, _EPS_SQ))
    o_ref[0] = (x * inv * g_ref[...] + b_ref[...]).astype(o_ref.dtype)


def _rms_norm_cl_kernel(x_ref, g_ref, o_ref):
    # x_ref: (TN, C)   g_ref: (1, C) = gamma * sqrt(C)   (used when C % 128 == 0)
    x = x_ref[...].astype(jnp.float32)
    ss = jnp.sum(x * x, axis=-1, keepdims=True)           # (TN, 1) lane reduce
    inv = jax.lax.rsqrt(jnp.maximum(ss, _EPS_SQ))
    o_ref[...] = (x * inv * g_ref[...]).astype(o_ref.dtype)


def _rms_norm_cl_bias_kernel(x_ref, g_ref, b_ref, o_ref):
    x = x_ref[...].astype(jnp.float32)
    ss = jnp.sum(x * x, axis=-1, keepdims=True)
    inv = jax.lax.rsqrt(jnp.maximum(ss, _EPS_SQ))
    o_ref[...] = (x * inv * g_ref[...] + b_ref[...]).astype(o_ref.dtype)


def _rms_norm_cl_grouped_kernel(x_ref, g_ref, m_ref, mt_ref, o_ref):
    # Lane-dense channel-last path for C % 128 != 0.
    # x_ref : (TN, G*C)  — G consecutive logical (N, C) rows packed per sublane row
    # g_ref : (1, G*C)   — gamma*sqrt(C) tiled G times
    # m_ref : (G*C, G)   — block-diagonal ones (segment-sum matrix)
    # mt_ref: (G, G*C)   — its transpose (segment-broadcast matrix)
    x = x_ref[...].astype(jnp.float32)
    ss = jnp.dot(x * x, m_ref[...], preferred_element_type=jnp.float32)   # (TN, G)
    inv = jax.lax.rsqrt(jnp.maximum(ss, _EPS_SQ))
    inv_full = jnp.dot(inv, mt_ref[...], preferred_element_type=jnp.float32)  # (TN, G*C)
    o_ref[...] = (x * inv_full * g_ref[...]).astype(o_ref.dtype)


def _rms_norm_cl_grouped_bias_kernel(x_ref, g_ref, m_ref, mt_ref, b_ref, o_ref):
    x = x_ref[...].astype(jnp.float32)
    ss = jnp.dot(x * x, m_ref[...], preferred_element_type=jnp.float32)
    inv = jax.lax.rsqrt(jnp.maximum(ss, _EPS_SQ))
    inv_full = jnp.dot(inv, mt_ref[...], preferred_element_type=jnp.float32)
    o_ref[...] = (x * inv_full * g_ref[...] + b_ref[...]).astype(o_ref.dtype)


# ------------------------------- wrappers ------------------------------------

def _rms_norm_channel_first(x, g_scaled, bias):
    """x: (B, C, *spatial), normalized over C.  Lane dim = flattened spatial."""
    b, c = x.shape[0], x.shape[1]
    s = 1
    for d in x.shape[2:]:
        s *= d
    x3 = x.reshape(b, c, s)                               # contiguous view, zero-cost
    ts = _pick_tile(s, c * x.dtype.itemsize, min_blocks=1 if b >= 2 else 2)
    grid = (b, pl.cdiv(s, ts))

    in_specs = [pl.BlockSpec((1, c, ts), lambda i, j: (i, 0, j)),
                pl.BlockSpec((c, 1), lambda i, j: (0, 0))]
    args = [x3, g_scaled.reshape(c, 1)]
    kernel = _rms_norm_cf_kernel
    if bias is not None:
        in_specs.append(pl.BlockSpec((c, 1), lambda i, j: (0, 0)))
        args.append(bias.reshape(c, 1))
        kernel = _rms_norm_cf_bias_kernel

    y = pl.pallas_call(
        kernel,
        out_shape=jax.ShapeDtypeStruct((b, c, s), x.dtype),
        grid=grid,
        in_specs=in_specs,
        out_specs=pl.BlockSpec((1, c, ts), lambda i, j: (i, 0, j)),
        compiler_params=_CPARAMS_2D,
    )(*args)
    return y.reshape(x.shape)


def _rms_norm_channel_last(x, g_scaled, bias):
    """x: (..., C), normalized over the last dim."""
    c = x.shape[-1]
    n = x.size // c
    itemsize = x.dtype.itemsize

    # Grouping factor so the lane (last) block dim is a multiple of 128
    # -> unmasked vld/vst even for small C (biggest measured store-side lever).
    g = 1 if c % 128 == 0 else 128 // math.gcd(c, 128)
    use_grouped = (g > 1 and n % g == 0
                   and g * c * itemsize * 8 <= _MAX_BLOCK_BYTES)

    if use_grouped:
        gc = g * c
        rows = n // g
        x2 = x.reshape(rows, gc)                          # contiguous view
        tn = _pick_tile(rows, gc * itemsize, min_blocks=2)
        grid = (pl.cdiv(rows, tn),)
        seg = (jnp.arange(gc, dtype=jnp.int32)[:, None] // c
               == jnp.arange(g, dtype=jnp.int32)[None, :]).astype(jnp.float32)
        in_specs = [pl.BlockSpec((tn, gc), lambda i: (i, 0)),
                    pl.BlockSpec((1, gc), lambda i: (0, 0)),
                    pl.BlockSpec((gc, g), lambda i: (0, 0)),
                    pl.BlockSpec((g, gc), lambda i: (0, 0))]
        args = [x2, jnp.tile(g_scaled, g).reshape(1, gc), seg, seg.T]
        kernel = _rms_norm_cl_grouped_kernel
        if bias is not None:
            in_specs.append(pl.BlockSpec((1, gc), lambda i: (0, 0)))
            args.append(jnp.tile(bias, g).reshape(1, gc))
            kernel = _rms_norm_cl_grouped_bias_kernel

        y = pl.pallas_call(
            kernel,
            out_shape=jax.ShapeDtypeStruct((rows, gc), x.dtype),
            grid=grid,
            in_specs=in_specs,
            out_specs=pl.BlockSpec((tn, gc), lambda i: (i, 0)),
            compiler_params=_CPARAMS_1D,
        )(*args)
        return y.reshape(x.shape)

    # Simple path: C already lane-dense (multiple of 128), or rows don't split
    # into groups; lane-masked if C < 128 but always correct.
    x2 = x.reshape(n, c)
    tn = _pick_tile(n, c * itemsize, min_blocks=2)
    grid = (pl.cdiv(n, tn),)
    in_specs = [pl.BlockSpec((tn, c), lambda i: (i, 0)),
                pl.BlockSpec((1, c), lambda i: (0, 0))]
    args = [x2, g_scaled.reshape(1, c)]
    kernel = _rms_norm_cl_kernel
    if bias is not None:
        in_specs.append(pl.BlockSpec((1, c), lambda i: (0, 0)))
        args.append(bias.reshape(1, c))
        kernel = _rms_norm_cl_bias_kernel

    y = pl.pallas_call(
        kernel,
        out_shape=jax.ShapeDtypeStruct((n, c), x.dtype),
        grid=grid,
        in_specs=in_specs,
        out_specs=pl.BlockSpec((tn, c), lambda i: (i, 0)),
        compiler_params=_CPARAMS_1D,
    )(*args)
    return y.reshape(x.shape)


def rms_norm(x, gamma, bias=None, channel_first=True):
    """F.normalize(x, dim=1 if channel_first else -1) * dim**0.5 * gamma + bias."""
    dim = x.shape[1] if channel_first else x.shape[-1]
    g_scaled = gamma.reshape(-1).astype(jnp.float32) * (dim ** 0.5)  # folded once
    b = None if bias is None else bias.reshape(-1).astype(jnp.float32)
    if channel_first:
        return _rms_norm_channel_first(x, g_scaled, b)
    return _rms_norm_channel_last(x, g_scaled, b)


class RMSNorm:
    """JAX/Pallas port of wan/modules/vae.py::RMS_norm (forward only)."""

    def __init__(self, dim, channel_first=True, images=True, bias=False):
        broadcastable_dims = (1, 1, 1) if not images else (1, 1)
        shape = (dim, *broadcastable_dims) if channel_first else (dim,)
        self.dim = dim
        self.channel_first = channel_first
        self.scale = dim ** 0.5
        self.gamma = jnp.ones(shape, jnp.float32)
        self.bias = jnp.zeros(shape, jnp.float32) if bias else None

    def __call__(self, x):
        return rms_norm(x, self.gamma, self.bias, self.channel_first)


# ------------------------------- reference -----------------------------------

def _rms_norm_ref(x, gamma, bias, channel_first):
    axis = 1 if channel_first else -1
    dim = x.shape[axis]
    xf = x.astype(jnp.float32)
    norm = jnp.sqrt(jnp.sum(xf * xf, axis=axis, keepdims=True))
    y = xf / jnp.maximum(norm, _EPS) * (dim ** 0.5) * gamma.astype(jnp.float32)
    if bias is not None:
        y = y + bias.astype(jnp.float32)
    return y.astype(x.dtype)


if __name__ == "__main__":
    key = jax.random.PRNGKey(0)
    ks = iter(jax.random.split(key, 16))

    jit_rms = jax.jit(rms_norm, static_argnames=("channel_first",))

    def check(y, r, tol):
        yf, rf = y.astype(jnp.float32), r.astype(jnp.float32)
        assert y.shape == r.shape
        assert jnp.allclose(yf, rf, rtol=tol, atol=tol), float(jnp.max(jnp.abs(yf - rf)))

    # 1) module defaults: channel_first=True, images=True, bias=False -> (B, C, H, W)
    m1 = RMSNorm(32, channel_first=True, images=True, bias=False)
    m1.gamma = 1.0 + 0.1 * jax.random.normal(next(ks), m1.gamma.shape, jnp.float32)
    x1 = jax.random.normal(next(ks), (2, 32, 32, 32), jnp.float32)
    y1 = jit_rms(x1, m1.gamma, m1.bias, channel_first=True)
    jax.block_until_ready(y1)
    check(y1, _rms_norm_ref(x1, m1.gamma, m1.bias, True), 1e-4)

    # 2) video norm: channel_first=True, images=False, bias=True -> (B, C, T, H, W)
    m2 = RMSNorm(96, channel_first=True, images=False, bias=True)
    m2.gamma = 1.0 + 0.1 * jax.random.normal(next(ks), m2.gamma.shape, jnp.float32)
    m2.bias = 0.05 * jax.random.normal(next(ks), m2.bias.shape, jnp.float32)
    x2 = jax.random.normal(next(ks), (1, 96, 4, 16, 16), jnp.float32)
    y2 = jit_rms(x2, m2.gamma, m2.bias, channel_first=True)
    jax.block_until_ready(y2)
    check(y2, _rms_norm_ref(x2, m2.gamma, m2.bias, True), 1e-4)

    # 3) channel_first=False, C=48 (not a multiple of 128) -> grouped lane-dense path
    m3 = RMSNorm(48, channel_first=False, images=True, bias=False)
    m3.gamma = 1.0 + 0.1 * jax.random.normal(next(ks), m3.gamma.shape, jnp.float32)
    x3 = jax.random.normal(next(ks), (2, 8, 16, 48), jnp.float32)
    y3 = jit_rms(x3, m3.gamma, m3.bias, channel_first=False)
    jax.block_until_ready(y3)
    check(y3, _rms_norm_ref(x3, m3.gamma, m3.bias, False), 1e-4)

    # 4) bf16, channel_first, spatial not a multiple of 128 -> partial (masked) last block
    m4 = RMSNorm(64, channel_first=True, images=True, bias=False)
    m4.gamma = 1.0 + 0.1 * jax.random.normal(next(ks), m4.gamma.shape, jnp.float32)
    x4 = jax.random.normal(next(ks), (1, 64, 8, 24), jnp.bfloat16)
    y4 = jit_rms(x4, m4.gamma, m4.bias, channel_first=True)
    jax.block_until_ready(y4)
    check(y4, _rms_norm_ref(x4, m4.gamma, m4.bias, True), 2e-2)

    # 5) channel_last + bias -> grouped kernel with bias
    m5 = RMSNorm(48, channel_first=False, images=True, bias=True)
    m5.gamma = 1.0 + 0.1 * jax.random.normal(next(ks), m5.gamma.shape, jnp.float32)
    m5.bias = 0.05 * jax.random.normal(next(ks), m5.bias.shape, jnp.float32)
    x5 = jax.random.normal(next(ks), (2, 8, 8, 48), jnp.float32)
    y5 = jit_rms(x5, m5.gamma, m5.bias, channel_first=False)
    jax.block_until_ready(y5)
    check(y5, _rms_norm_ref(x5, m5.gamma, m5.bias, False), 1e-4)

    # 6) channel_last fallback (rows don't split into groups) -> masked simple path
    m6 = RMSNorm(48, channel_first=False, images=True, bias=False)
    m6.gamma = 1.0 + 0.1 * jax.random.normal(next(ks), m6.gamma.shape, jnp.float32)
    x6 = jax.random.normal(next(ks), (1, 5, 48), jnp.float32)
    y6 = jit_rms(x6, m6.gamma, m6.bias, channel_first=False)
    jax.block_until_ready(y6)
    check(y6, _rms_norm_ref(x6, m6.gamma, m6.bias, False), 1e-4)

    print("KERNEL_OK")
</pallas_src>

<mosaic_0001>
module attributes {stable_mosaic.version = 11 : i64} {
  func.func @_rms_norm_cf_kernel(%arg0: i32, %arg1: i32, %arg2: memref<1x32x1024xf32, #tpu.memory_space<vmem>>, %arg3: memref<32x1xf32, #tpu.memory_space<vmem>>, %arg4: memref<1x32x1024xf32, #tpu.memory_space<vmem>>) attributes {dimension_semantics = [#tpu.dimension_semantics<parallel>, #tpu.dimension_semantics<parallel>], iteration_bounds = array<i64: 2, 1>, scalar_prefetch = 0 : i64, scratch_operands = 0 : i64, tpu.core_type = #tpu.core_type<tc>, window_params = [{transform_indices = @transform_0, window_bounds = array<i64: 1, 32, 1024>}, {pipeline_mode = #tpu.pipeline_mode<synchronous>, transform_indices = @transform_1, window_bounds = array<i64: 32, 1>}, {transform_indices = @transform_2, window_bounds = array<i64: 1, 32, 1024>}]} {
    %c0 = arith.constant 0 : index
    %c0_0 = arith.constant 0 : index
    %c0_1 = arith.constant 0 : index
    %0 = vector.load %arg2[%c0, %c0_0, %c0_1] : memref<1x32x1024xf32, #tpu.memory_space<vmem>>, vector<1x32x1024xf32>
    %1 = vector.shape_cast %0 : vector<1x32x1024xf32> to vector<32x1024xf32>
    %2 = arith.mulf %1, %1 : vector<32x1024xf32>
    %cst = arith.constant dense<0.000000e+00> : vector<1024xf32>
    %3 = vector.multi_reduction <add>, %2, %cst [0] : vector<32x1024xf32> to vector<1024xf32>
    %4 = vector.shape_cast %3 : vector<1024xf32> to vector<1x1024xf32>
    %cst_2 = arith.constant 1.000000e-24 : f32
    %5 = vector.broadcast %cst_2 : f32 to vector<1x1024xf32>
    %6 = arith.maximumf %4, %5 : vector<1x1024xf32>
    %7 = math.rsqrt %6 : vector<1x1024xf32>
    %8 = vector.broadcast %7 : vector<1x1024xf32> to vector<32x1024xf32>
    %9 = arith.mulf %1, %8 : vector<32x1024xf32>
    %c0_3 = arith.constant 0 : index
    %c0_4 = arith.constant 0 : index
    %10 = vector.load %arg3[%c0_3, %c0_4] : memref<32x1xf32, #tpu.memory_space<vmem>>, vector<32x1xf32>
    %11 = vector.broadcast %10 : vector<32x1xf32> to vector<32x1024xf32>
    %12 = arith.mulf %9, %11 : vector<32x1024xf32>
    %c0_5 = arith.constant 0 : index
    %c0_6 = arith.constant 0 : index
    %c0_7 = arith.constant 0 : index
    %13 = vector.load %arg4[%c0_5, %c0_6, %c0_7] : memref<1x32x1024xf32, #tpu.memory_space<vmem>>, vector<1x32x1024xf32>
    %14 = vector.shape_cast %13 : vector<1x32x1024xf32> to vector<32x1024xf32>
    %15 = vector.shape_cast %12 : vector<32x1024xf32> to vector<1x32x1024xf32>
    tpu.vector_store %arg4[%c0_5, %c0_6, %c0_7], %15 {strides = array<i32>} : memref<1x32x1024xf32, #tpu.memory_space<vmem>>, vector<1x32x1024xf32>,
    return
  }
  func.func @transform_0(%arg0: i32, %arg1: i32) -> (i32, i32, i32) {
    %c0_i32 = arith.constant 0 : i32
    %c0_i32_0 = arith.constant 0 : i32
    return %arg0, %c0_i32, %arg1 : i32, i32, i32
  }
  func.func @transform_1(%arg0: i32, %arg1: i32) -> (i32, i32) {
    %c0_i32 = arith.constant 0 : i32
    %c0_i32_0 = arith.constant 0 : i32
    %c0_i32_1 = arith.constant 0 : i32
    return %c0_i32, %c0_i32_0 : i32, i32
  }
  func.func @transform_2(%arg0: i32, %arg1: i32) -> (i32, i32, i32) {
    %c0_i32 = arith.constant 0 : i32
    %c0_i32_0 = arith.constant 0 : i32
    return %arg0, %c0_i32, %arg1 : i32, i32, i32
  }
}

</mosaic_0001>

<bundles_post_ra>
// kernel: rms_norm.1
= control target key start
LH: loop header
LB: loop body
LE: loop exit
PB: predicated region body
PF: predicated region fallthrough
CT: control target
= control target key end

     0   :  { %s638_s9 = smov 0   ;;  %s640_s10 = smov 0   ;;  %s936_s0 = inlined_call_operand.vmem [shape: f32[2,32,1024], index: 0, kind: input, shape index: {}]   ;;  %s937_s1 = inlined_call_operand.vmem [shape: f32[32,1], index: 1, kind: input, shape index: {}]   ;;  %s938_s2 = inlined_call_operand.vmem [shape: f32[2,32,1024], index: 2, kind: output, shape index: {}]  }
   0x1   :  { %s642_s11 = smov 0  }
   0x2 LB: > { %s24_s12 = sadd.s32 1, %s616_s10  ;;  %p546_p0 = scmp.ge.s32.totalorder %s620_s11, 1  ;;  %s620_s11 = sphi %s642_s11, %s12_s11   ;;  %s616_s10 = sphi %s640_s10, %s946_s10   ;;  %s612_s9 = sphi %s638_s9, %s945_s9  }
   0x3   : > { %p26_p1 = scmp.ge.s32.totalorder %s24_s12, 2  ;;  %p133_p2 = scmp.lt.s32.totalorder %s620_s11, 3 }
   0x5   : > { %s948_s12 = smov (%p26_p1, %s24_s12), 0  ;;  %p134_p3 = pnand %p546_p0, %p133_p2 }
   0x7   : > { %137 = sbr.rel (%p134_p3) target bundleno = 163 (0xa3), region = 28 }
   0xe   : > { %v369_v0 = vld [vmem:[%s937_s1 + $0x10] sm:$0xff]  ;;  %v367_v1 = vld [vmem:[%s937_s1] sm:$0xff]  ;;  %v622_v2 = vmov 0   ;;  %v370_v3 = vld [vmem:[%s937_s1 + $0x18] sm:$0xff]  ;;  %p164_p4 = scmp.lt.s32.totalorder %s612_s9, 1 }
   0xf   : > { %581 = vset.pattern.permute.xlu1 %v622_v2  ;;  %580 = vset.pattern.permute.xlu0 %v622_v2  ;;  %v368_v4 = vld [vmem:[%s937_s1 + $0x8] sm:$0xff] }
  0x10   : > { %383 = vperm.xlu1 %581, %v369_v0   ;;  %373 = vperm.xlu0 %580, %v367_v1   ;;  %s950_s9 = smov (!%p164_p4, %s612_s9), 1 }
  0x11   : > { %s553_s21 = sshll.u32 %s950_s9, 8 }
  0x12   : > { %s676_s24 = scalar_lea.vmem %s936_s0, %s553_s21  ;;  %s883_s27 = scalar_lea.vmem %s938_s2, %s553_s21 }
  0x13   : > { %v679_v5 = vld [vmem:[%s676_s24] sm:$0xff]  ;;  %v685_v7 = vld [vmem:[%s676_s24 + $0x8] sm:$0xff]  ;;  %v691_v9 = vld [vmem:[%s676_s24 + $0x10] sm:$0xff] }
  0x14   : > { %388 = vperm.xlu1 %581, %v370_v3   ;;  %378 = vperm.xlu0 %580, %v368_v4   ;;  %v682_v6 = vld [vmem:[%s676_s24 + $0x40] sm:$0xff]  ;;  %v688_v8 = vld [vmem:[%s676_s24 + $0x48] sm:$0xff]  ;;  %v694_v10 = vld [vmem:[%s676_s24 + $0x50] sm:$0xff]  ;;  %v215_v13 = vmul.f32 %v679_v5, %v679_v5  ;;  %v216_v18 = vmul.f32 %v685_v7, %v685_v7  ;;  %v217_v23 = vmul.f32 %v691_v9, %v691_v9 }
  0x15   : > { %v697_v11 = vld [vmem:[%s676_s24 + $0x18] sm:$0xff]  ;;  %v223_v14 = vmul.f32 %v682_v6, %v682_v6  ;;  %v707_v15 = vld [vmem:[%s676_s24 + $0x20] sm:$0xff]  ;;  %v224_v19 = vmul.f32 %v688_v8, %v688_v8  ;;  %v720_v20 = vld [vmem:[%s676_s24 + $0x28] sm:$0xff]  ;;  %v225_v24 = vmul.f32 %v694_v10, %v694_v10 }
  0x16   : > { %v700_v12 = vld [vmem:[%s676_s24 + $0x58] sm:$0xff]  ;;  %v710_v16 = vld [vmem:[%s676_s24 + $0x60] sm:$0xff]  ;;  %v723_v21 = vld [vmem:[%s676_s24 + $0x68] sm:$0xff]  ;;  %v218_v28 = vmul.f32 %v697_v11, %v697_v11  ;;  %v219_v33 = vmul.f32 %v707_v15, %v707_v15  ;;  %v220_v39 = vmul.f32 %v720_v20, %v720_v20 }
  0x17   : > { %v713_v17 = vld [vmem:[%s676_s24 + $0x80] sm:$0xff]  ;;  %v726_v22 = vld [vmem:[%s676_s24 + $0x88] sm:$0xff]  ;;  %v733_v25 = vld [vmem:[%s676_s24 + $0x30] sm:$0xff]  ;;  %v226_v29 = vmul.f32 %v700_v12, %v700_v12  ;;  %v227_v34 = vmul.f32 %v710_v16, %v710_v16  ;;  %v247_v36 = vadd.f32 %v223_v14, %v215_v13  ;;  %v228_v40 = vmul.f32 %v723_v21, %v723_v21 }
  0x18   : > { %v736_v26 = vld [vmem:[%s676_s24 + $0x70] sm:$0xff]  ;;  %v746_v30 = vld [vmem:[%s676_s24 + $0x38] sm:$0xff]  ;;  %v231_v35 = vmul.f32 %v713_v17, %v713_v17  ;;  %v761_v37 = vld [vmem:[%s676_s24 + $0xa0] sm:$0xff]  ;;  %v232_v41 = vmul.f32 %v726_v22, %v726_v22  ;;  %v256_v42 = vadd.f32 %v224_v19, %v216_v18  ;;  %v221_v45 = vmul.f32 %v733_v25, %v733_v25 }
  0x19   : > { %941 = vst [vmem:[#allocation2_spill] sm:$0xff] %v736_v26  ;;  %v739_v27 = vld [vmem:[%s676_s24 + $0x90] sm:$0xff]  ;;  %v749_v31 = vld [vmem:[%s676_s24 + $0x78] sm:$0xff]  ;;  %v764_v38 = vld [vmem:[%s676_s24 + $0xc0] sm:$0xff]  ;;  %v229_v46 = vmul.f32 %v736_v26, %v736_v26  ;;  %v265_v48 = vadd.f32 %v225_v24, %v217_v23  ;;  %v222_v51 = vmul.f32 %v746_v30, %v746_v30  ;;  %v274_v54 = vadd.f32 %v226_v29, %v218_v28 }
  0x1a   : > { %942 = vst [vmem:[#allocation3_spill] sm:$0xff] %v749_v31  ;;  %v752_v32 = vld [vmem:[%s676_s24 + $0x98] sm:$0xff]  ;;  %v773_v43 = vld [vmem:[%s676_s24 + $0xa8] sm:$0xff]  ;;  %v233_v47 = vmul.f32 %v739_v27, %v739_v27  ;;  %v785_v49 = vld [vmem:[%s676_s24 + $0xb0] sm:$0xff]  ;;  %v230_v52 = vmul.f32 %v749_v31, %v749_v31  ;;  %v235_v57 = vmul.f32 %v761_v37, %v761_v37  ;;  %v239_v58 = vmul.f32 %v764_v38, %v764_v38 }
  0x1b   : > { %v776_v44 = vld [vmem:[%s676_s24 + $0xc8] sm:$0xff]  ;;  %v788_v50 = vld [vmem:[%s676_s24 + $0xd0] sm:$0xff]  ;;  %v234_v53 = vmul.f32 %v752_v32, %v752_v32  ;;  %v797_v55 = vld [vmem:[%s676_s24 + $0xb8] sm:$0xff]  ;;  %v248_v59 = vadd.f32 %v247_v36, %v231_v35  ;;  %v283_v60 = vadd.f32 %v227_v34, %v219_v33  ;;  %v236_v62 = vmul.f32 %v773_v43, %v773_v43 }
  0x1c   : > { %v800_v56 = vld [vmem:[%s676_s24 + $0xd8] sm:$0xff]  ;;  %v807_v61 = vld [vmem:[%s676_s24 + $0xe0] sm:$0xff]  ;;  %v240_v63 = vmul.f32 %v776_v44, %v776_v44  ;;  %v257_v0 = vadd.f32 %v256_v42, %v232_v41  ;;  %v292_v1 = vadd.f32 %v228_v40, %v220_v39  ;;  %v814_v2 = vld [vmem:[%s676_s24 + $0xe8] sm:$0xff]  ;;  %v237_v3 = vmul.f32 %v785_v49, %v785_v49 }
  0x1d   : > { %v241_v4 = vmul.f32 %v788_v50, %v788_v50  ;;  %v266_v13 = vadd.f32 %v265_v48, %v233_v47  ;;  %v301_v14 = vadd.f32 %v229_v46, %v221_v45  ;;  %v821_v18 = vld [vmem:[%s676_s24 + $0xf0] sm:$0xff]  ;;  %v238_v19 = vmul.f32 %v797_v55, %v797_v55  ;;  %v828_v29 = vld [vmem:[%s676_s24 + $0xf8] sm:$0xff] }
  0x1e   : > { %v242_v23 = vmul.f32 %v800_v56, %v800_v56  ;;  %v275_v24 = vadd.f32 %v274_v54, %v234_v53  ;;  %v310_v28 = vadd.f32 %v230_v52, %v222_v51  ;;  %v243_v33 = vmul.f32 %v807_v61, %v807_v61 }
  0x1f   : > { %v249_v34 = vadd.f32 %v248_v59, %v239_v58  ;;  %v284_v35 = vadd.f32 %v283_v60, %v235_v57  ;;  %v244_v36 = vmul.f32 %v814_v2, %v814_v2  ;;  %v258_v39 = vadd.f32 %v257_v0, %v240_v63 }
  0x20   : > { %v293_v40 = vadd.f32 %v292_v1, %v236_v62  ;;  %v245_v41 = vmul.f32 %v821_v18, %v821_v18  ;;  %v267_v42 = vadd.f32 %v266_v13, %v241_v4  ;;  %v302_v45 = vadd.f32 %v301_v14, %v237_v3 }
  0x21   : > { %v246_v46 = vmul.f32 %v828_v29, %v828_v29  ;;  %v276_v47 = vadd.f32 %v275_v24, %v242_v23  ;;  %v311_v48 = vadd.f32 %v310_v28, %v238_v19  ;;  %v250_v51 = vrot.slane %v249_v34, 4 }
  0x22   : > { %v285_v52 = vadd.f32 %v284_v35, %v243_v33  ;;  %v259_v53 = vrot.slane %v258_v39, 4  ;;  %v294_v54 = vadd.f32 %v293_v40, %v244_v36  ;;  %v268_v57 = vrot.slane %v267_v42, 4 }
  0x23   : > { %v303_v58 = vadd.f32 %v302_v45, %v245_v41  ;;  %v277_v59 = vrot.slane %v276_v47, 4  ;;  %v312_v60 = vadd.f32 %v311_v48, %v246_v46  ;;  %v251_v63 = vadd.f32 %v250_v51, %v249_v34 }
  0x24   : > { %v286_v62 = vrot.slane %v285_v52, 4  ;;  %v260_v0 = vadd.f32 %v259_v53, %v258_v39  ;;  %v295_v1 = vrot.slane %v294_v54, 4  ;;  %v269_v31 = vadd.f32 %v268_v57, %v267_v42 }
  0x25   : > { %v304_v4 = vrot.slane %v303_v58, 4  ;;  %v278_v3 = vadd.f32 %v277_v59, %v276_v47  ;;  %v313_v13 = vrot.slane %v312_v60, 4  ;;  %v252_v14 = vrot.slane %v251_v63, 2 }
  0x26   : > { %v287_v26 = vadd.f32 %v286_v62, %v285_v52  ;;  %v261_v23 = vrot.slane %v260_v0, 2  ;;  %v296_v19 = vadd.f32 %v295_v1, %v294_v54  ;;  %v270_v24 = vrot.slane %v269_v31, 2 }
  0x27   : > { %v305_v28 = vadd.f32 %v304_v4, %v303_v58  ;;  %v279_v33 = vrot.slane %v278_v3, 2  ;;  %v314_v35 = vadd.f32 %v313_v13, %v312_v60  ;;  %v253_v36 = vadd.f32 %v252_v14, %v251_v63 }
  0x28   : > { %v288_v40 = vrot.slane %v287_v26, 2  ;;  %v262_v41 = vadd.f32 %v261_v23, %v260_v0  ;;  %v297_v45 = vrot.slane %v296_v19, 2  ;;  %v271_v34 = vadd.f32 %v270_v24, %v269_v31 }
  0x29   : > { %v306_v46 = vrot.slane %v305_v28, 2  ;;  %v280_v39 = vadd.f32 %v279_v33, %v278_v3  ;;  %v315_v48 = vrot.slane %v314_v35, 2  ;;  %v254_v42 = vrot.slane %v253_v36, 1 }
  0x2a   : > { %v289_v51 = vadd.f32 %v288_v40, %v287_v26  ;;  %v263_v47 = vrot.slane %v262_v41, 1  ;;  %v298_v53 = vadd.f32 %v297_v45, %v296_v19  ;;  %v272_v57 = vrot.slane %v271_v34, 1 }
  0x2b   : > { %v307_v52 = vadd.f32 %v306_v46, %v305_v28  ;;  %v281_v59 = vrot.slane %v280_v39, 1  ;;  %v316_v54 = vadd.f32 %v315_v48, %v314_v35  ;;  %v255_v62 = vadd.f32 %v254_v42, %v253_v36 }
  0x2c   : > { %v290_v58 = vrot.slane %v289_v51, 1  ;;  %v264_v1 = vadd.f32 %v263_v47, %v262_v41  ;;  %v299_v60 = vrot.slane %v298_v53, 1  ;;  %v273_v63 = vadd.f32 %v272_v57, %v271_v34 }
  0x2d   : > { %v308_v4 = vrot.slane %v307_v52, 1  ;;  %v282_v0 = vadd.f32 %v281_v59, %v280_v39  ;;  %v317_v13 = vrot.slane %v316_v54, 1  ;;  %v319_v14 = vmax.f32 %v255_v62, 1e-24 }
  0x2e   : > { %v291_v31 = vadd.f32 %v290_v58, %v289_v51  ;;  %v300_v3 = vadd.f32 %v299_v60, %v298_v53  ;;  %v320_v23 = vmax.f32 %v264_v1, 1e-24  ;;  %v321_v26 = vmax.f32 %v273_v63, 1e-24 }
  0x2f   : > { %v309_v24 = vadd.f32 %v308_v4, %v307_v52  ;;  %v318_v33 = vadd.f32 %v317_v13, %v316_v54  ;;  %v322_v19 = vmax.f32 %v282_v0, 1e-24  ;;  %582 = vrsqrt.f32 %v319_v14 }
  0x30   : > { %v323_v40 = vmax.f32 %v291_v31, 1e-24  ;;  %v324_v28 = vmax.f32 %v300_v3, 1e-24  ;;  %584 = vrsqrt.f32 %v320_v23 }
  0x31   : > { %v325_v35 = vmax.f32 %v309_v24, 1e-24  ;;  %586 = vrsqrt.f32 %v321_v26  ;;  %v326_v36 = vmax.f32 %v318_v33, 1e-24 }
  0x32   : > { %588 = vrsqrt.f32 %v322_v19 }
  0x33   : > { %590 = vrsqrt.f32 %v323_v40 }
  0x34   : > { %592 = vrsqrt.f32 %v324_v28 }
  0x35   : > { %594 = vrsqrt.f32 %v325_v35 }
  0x36   : > { %596 = vrsqrt.f32 %v326_v36 }
  0x39   : > { %v583_v41 = vpop.eup %582 }
  0x3a   : > { %v585_v45 = vpop.eup %584  ;;  %v335_v42 = vmul.f32 %v583_v41, %v679_v5  ;;  %v351_v51 = vmul.f32 %v583_v41, %v713_v17  ;;  %v359_v47 = vmul.f32 %v583_v41, %v764_v38  ;;  %v842_v53 = vmul.f32 %v583_v41, %v682_v6 }
  0x3b   : > { %v587_v34 = vpop.eup %586  ;;  %v336_v52 = vmul.f32 %v585_v45, %v685_v7  ;;  %v352_v59 = vmul.f32 %v585_v45, %v726_v22  ;;  %v360_v54 = vmul.f32 %v585_v45, %v776_v44  ;;  %v848_v62 = vmul.f32 %v585_v45, %v688_v8 }
  0x3c   : > { %v589_v46 = vpop.eup %588  ;;  %v337_v5 = vmul.f32 %v587_v34, %v691_v9  ;;  %v353_v17 = vmul.f32 %v587_v34, %v739_v27  ;;  %v361_v38 = vmul.f32 %v587_v34, %v788_v50  ;;  %v854_v6 = vmul.f32 %v587_v34, %v694_v10 }
  0x3d   : > { %v591_v39 = vpop.eup %590  ;;  %v338_v1 = vmul.f32 %v589_v46, %v697_v11  ;;  %v354_v7 = vmul.f32 %v589_v46, %v752_v32  ;;  %v362_v22 = vmul.f32 %v589_v46, %v800_v56  ;;  %v860_v8 = vmul.f32 %v589_v46, %v700_v12 }
  0x3e   : > { %v593_v48 = vpop.eup %592  ;;  %v339_v44 = vmul.f32 %v591_v39, %v707_v15  ;;  %v355_v9 = vmul.f32 %v591_v39, %v761_v37  ;;  %v363_v27 = vmul.f32 %v591_v39, %v807_v61  ;;  %v866_v50 = vmul.f32 %v591_v39, %v710_v16 }
  0x3f   : > { %v595_v57 = vpop.eup %594  ;;  %v340_v10 = vmul.f32 %v593_v48, %v720_v20  ;;  %v356_v56 = vmul.f32 %v593_v48, %v773_v43  ;;  %v364_v60 = vmul.f32 %v593_v48, %v814_v2  ;;  %v876_v37 = vmul.f32 %v593_v48, %v723_v21 }
  0x40   : > { %v597_v58 = vpop.eup %596  ;;  %v341_v11 = vmul.f32 %v595_v57, %v733_v25  ;;  %v357_v12 = vmul.f32 %v595_v57, %v785_v49  ;;  %v365_v15 = vmul.f32 %v595_v57, %v821_v18  ;;  %v944_v49 = vld [vmem:[#allocation3_spill] sm:$0xff] }
  0x41   : > { %v342_v32 = vmul.f32 %v597_v58, %v746_v30  ;;  %v358_v20 = vmul.f32 %v597_v58, %v797_v55  ;;  %v366_v25 = vmul.f32 %v597_v58, %v828_v29  ;;  %v943_v30 = vld [vmem:[#allocation2_spill] sm:$0xff]  ;;  %v350_v21 = vmul.f32 %v597_v58, %v944_v49 }
  0x42   : > { %v349_v43 = vmul.f32 %v595_v57, %v943_v30 }
  0x8f   : > { %v384_v61 = vpop.permute.xlu1 %383  ;;  %v374_v16 = vpop.permute.xlu0 %373 }
  0x90   : > { %v391_v2 = vmul.f32 %v374_v16, %v335_v42  ;;  %v392_v18 = vmul.f32 %v374_v16, %v336_v52  ;;  %v393_v63 = vmul.f32 %v374_v16, %v337_v5  ;;  %v394_v4 = vmul.f32 %v374_v16, %v338_v1 }
  0x91   : > { %v395_v0 = vmul.f32 %v374_v16, %v339_v44  ;;  %v396_v13 = vmul.f32 %v374_v16, %v340_v10  ;;  %v397_v31 = vmul.f32 %v374_v16, %v341_v11  ;;  %v398_v55 = vmul.f32 %v374_v16, %v342_v32 }
  0x92   : > { %v407_v14 = vmul.f32 %v384_v61, %v351_v51  ;;  %v408_v29 = vmul.f32 %v384_v61, %v352_v59  ;;  %v409_v3 = vmul.f32 %v384_v61, %v353_v17  ;;  %v410_v23 = vmul.f32 %v384_v61, %v354_v7  ;;  %423 = vst [vmem:[%s883_s27] sm:$0xff] %v391_v2 }
  0x93   : > { %424 = vst [vmem:[%s883_s27 + $0x8] sm:$0xff] %v392_v18  ;;  %425 = vst [vmem:[%s883_s27 + $0x10] sm:$0xff] %v393_v63  ;;  %v389_v24 = vpop.permute.xlu1 %388  ;;  %v411_v26 = vmul.f32 %v384_v61, %v355_v9  ;;  %v412_v33 = vmul.f32 %v384_v61, %v356_v56  ;;  %v413_v19 = vmul.f32 %v384_v61, %v357_v12  ;;  %v379_v28 = vpop.permute.xlu0 %378 }
  0x94   : > { %426 = vst [vmem:[%s883_s27 + $0x18] sm:$0xff] %v394_v4  ;;  %v414_v40 = vmul.f32 %v384_v61, %v358_v20  ;;  %427 = vst [vmem:[%s883_s27 + $0x20] sm:$0xff] %v395_v0  ;;  %v415_v35 = vmul.f32 %v389_v24, %v359_v47  ;;  %v416_v36 = vmul.f32 %v389_v24, %v360_v54 }
  0x95   : > { %428 = vst [vmem:[%s883_s27 + $0x28] sm:$0xff] %v396_v13  ;;  %429 = vst [vmem:[%s883_s27 + $0x30] sm:$0xff] %v397_v31  ;;  %v417_v41 = vmul.f32 %v389_v24, %v361_v38  ;;  %v418_v45 = vmul.f32 %v389_v24, %v362_v22  ;;  %v419_v34 = vmul.f32 %v389_v24, %v363_v27 }
  0x96   : > { %430 = vst [vmem:[%s883_s27 + $0x38] sm:$0xff] %v398_v55  ;;  %439 = vst [vmem:[%s883_s27 + $0x80] sm:$0xff] %v407_v14  ;;  %v420_v46 = vmul.f32 %v389_v24, %v364_v60  ;;  %v421_v39 = vmul.f32 %v389_v24, %v365_v15  ;;  %v422_v48 = vmul.f32 %v389_v24, %v366_v25 }
  0x97   : > { %440 = vst [vmem:[%s883_s27 + $0x88] sm:$0xff] %v408_v29  ;;  %441 = vst [vmem:[%s883_s27 + $0x90] sm:$0xff] %v409_v3  ;;  %v399_v42 = vmul.f32 %v379_v28, %v842_v53  ;;  %v400_v51 = vmul.f32 %v379_v28, %v848_v62  ;;  %v401_v47 = vmul.f32 %v379_v28, %v854_v6 }
  0x98   : > { %442 = vst [vmem:[%s883_s27 + $0x98] sm:$0xff] %v410_v23  ;;  %443 = vst [vmem:[%s883_s27 + $0xa0] sm:$0xff] %v411_v26  ;;  %v402_v57 = vmul.f32 %v379_v28, %v860_v8  ;;  %v403_v52 = vmul.f32 %v379_v28, %v866_v50  ;;  %v404_v59 = vmul.f32 %v379_v28, %v876_v37 }
  0x99   : > { %444 = vst [vmem:[%s883_s27 + $0xa8] sm:$0xff] %v412_v33  ;;  %445 = vst [vmem:[%s883_s27 + $0xb0] sm:$0xff] %v413_v19  ;;  %v405_v54 = vmul.f32 %v379_v28, %v349_v43  ;;  %v406_v53 = vmul.f32 %v379_v28, %v350_v21 }
  0x9a   : > { %446 = vst [vmem:[%s883_s27 + $0xb8] sm:$0xff] %v414_v40  ;;  %447 = vst [vmem:[%s883_s27 + $0xc0] sm:$0xff] %v415_v35 }
  0x9b   : > { %448 = vst [vmem:[%s883_s27 + $0xc8] sm:$0xff] %v416_v36  ;;  %449 = vst [vmem:[%s883_s27 + $0xd0] sm:$0xff] %v417_v41 }
  0x9c   : > { %450 = vst [vmem:[%s883_s27 + $0xd8] sm:$0xff] %v418_v45  ;;  %451 = vst [vmem:[%s883_s27 + $0xe0] sm:$0xff] %v419_v34 }
  0x9d   : > { %452 = vst [vmem:[%s883_s27 + $0xe8] sm:$0xff] %v420_v46  ;;  %453 = vst [vmem:[%s883_s27 + $0xf0] sm:$0xff] %v421_v39 }
  0x9e   : > { %454 = vst [vmem:[%s883_s27 + $0xf8] sm:$0xff] %v422_v48  ;;  %431 = vst [vmem:[%s883_s27 + $0x40] sm:$0xff] %v399_v42 }
  0x9f   : > { %432 = vst [vmem:[%s883_s27 + $0x48] sm:$0xff] %v400_v51  ;;  %433 = vst [vmem:[%s883_s27 + $0x50] sm:$0xff] %v401_v47 }
  0xa0   : > { %434 = vst [vmem:[%s883_s27 + $0x58] sm:$0xff] %v402_v57  ;;  %435 = vst [vmem:[%s883_s27 + $0x60] sm:$0xff] %v403_v52 }
  0xa1   : > { %436 = vst [vmem:[%s883_s27 + $0x68] sm:$0xff] %v404_v59  ;;  %437 = vst [vmem:[%s883_s27 + $0x70] sm:$0xff] %v405_v54 }
  0xa2   : > { %438 = vst [vmem:[%s883_s27 + $0x78] sm:$0xff] %v406_v53 }
  0xa3 PF: > { %s12_s11 = sadd.s32 1, %s620_s11   ;;  %s945_s9 = smov %s616_s10 }
  0xa4   : > { %p9_p5 = scmp.ge.s32.totalorder %s12_s11, 4   ;;  %s946_s10 = smov %s948_s12 }
  0xa6   :  { %11 = sbr.rel (!%p9_p5) target bundleno = 2 (0x2), region = 58 }

</bundles_post_ra>
